<compile_context>
chip_gen: v7x
topology: tpu7x:2x2x1
jax: 0.10.0
libtpu: 0.0.40
codegen_flags: <defaults>
</compile_context>

<pallas_src>
import functools

import jax
import jax.numpy as jnp
from jax.experimental import pallas as pl
from jax.experimental.pallas import tpu as pltpu

HIDDEN = 1000      # hidden size of the PyTorch module
HP = 1024          # lane-aligned (multiple of 128) padded hidden size
OUT_LANES = 128    # lane-dense output slab width
BN_EPS = 1e-5


def _ptt_kernel(
    x_ref,        # [bm, D]          f32 input tile
    wbig_ref,     # [D, 2*HP]        BN-folded p_fc1 weight || t_fc1 x-part (bf16)
    bbig_ref,     # [1, 2*HP]        BN-folded p_fc1 bias   || t_fc1 bias (f32)
    tw1p_ref,     # [1, HP]          t_fc1 column multiplying p_no_sigmoid
    w2row_ref,    # [1, HP]          p_fc2 weight (transposed, zero-padded)
    tw2row_ref,   # [1, HP]          t_fc2 weight (transposed, zero-padded)
    bias2_ref,    # [2]   (SMEM)     [p_fc2 bias, t_fc2 bias]
    out_ref,      # [bm, OUT_LANES]  lane 0 = t, lane 1 = sigmoid(p)
):
    x = x_ref[...]

    # One fused MXU matmul (bf16 x bf16 -> f32) covers both branches' x-side
    # projections; all subsequent elementwise work stays f32.
    h = (
        jnp.dot(x.astype(wbig_ref.dtype), wbig_ref[...],
                preferred_element_type=jnp.float32)
        + bbig_ref[...]
    )                                                    # [bm, 2*HP] f32

    # --- probability branch (BN folded on host; Dropout in eval mode == identity) ---
    p = jnp.maximum(h[:, :HP], 0.0)                      # [bm, HP]
    # p_fc2 (N=1): VPU multiply + lane reduce instead of a <1%-utilized MXU matmul.
    p_ns = jnp.sum(p * w2row_ref[...], axis=-1, keepdims=True) + bias2_ref[0]
    p_sig = jax.nn.sigmoid(p_ns)                         # [bm, 1]

    # --- time branch: t_fc1(cat(x, p_no_sigmoid)) decomposed into x-part + p-part ---
    t = jnp.maximum(h[:, HP:] + p_ns * tw1p_ref[...], 0.0)
    t = jnp.sum(t * tw2row_ref[...], axis=-1, keepdims=True) + bias2_ref[1]
    t = jnp.maximum(t, 0.0)                              # [bm, 1]

    # Single lane-dense output slab: one unmasked store, one writeback DMA.
    lane = jax.lax.broadcasted_iota(jnp.int32, out_ref.shape, 1)
    out_ref[...] = jnp.where(lane == 0, t, jnp.where(lane == 1, p_sig, 0.0))


def fold_and_pad_params(params, weight_dtype=jnp.bfloat16):
    """Fold eval-mode BN into p_fc1, fuse the two x-side weights into [D, 2*HP],
    and zero-pad the hidden dim 1000 -> 1024 so every lane dim is 128-aligned.
    Only the MXU operand (wbig) is cast to weight_dtype; biases stay f32."""
    scale = params["gamma"] * jax.lax.rsqrt(params["var"] + BN_EPS)    # [1, H]
    w1f = params["w1"] * scale                                         # [D, H]
    b1f = (params["b1"] - params["mean"]) * scale + params["beta"]     # [1, H]

    pad = lambda a: jnp.pad(a, ((0, 0), (0, HP - HIDDEN)))
    wbig = jnp.concatenate([pad(w1f), pad(params["tw1x"])], axis=1)    # [D, 2*HP]
    bbig = jnp.concatenate([pad(b1f), pad(params["tb1"])], axis=1)     # [1, 2*HP]
    tw1p = pad(params["tw1p"])                                         # [1, HP]
    w2row = pad(params["w2"].T)                                        # [1, HP]
    tw2row = pad(params["tw2"].T)                                      # [1, HP]
    bias2 = jnp.concatenate(
        [params["b2"].reshape(-1), params["tb2"].reshape(-1)]
    ).astype(jnp.float32)                                              # [2]
    return wbig.astype(weight_dtype), bbig, tw1p, w2row, tw2row, bias2


def _round_up(a, m):
    return -(-a // m) * m


@functools.partial(jax.jit, static_argnames=("block_m", "weight_dtype"))
def probability_to_time_forward(x, params, *, block_m=128,
                                weight_dtype=jnp.bfloat16):
    B, D = x.shape
    wbig, bbig, tw1p, w2row, tw2row, bias2 = fold_and_pad_params(
        params, weight_dtype=weight_dtype)

    # Batch tiling:
    #   * B <= 16: a single full-extent program (block == array dims).
    #   * otherwise: at least 2 grid programs (v7x has 2 TensorCores and the
    #     "parallel" axis only helps with >= 2 steps), capped at block_m rows.
    # No host-side pad of x: the ragged final block is handled by Pallas and
    # the out-of-range rows are discarded by the out[:B] slice below.
    if B <= 16:
        bm = B
    else:
        bm = min(block_m, _round_up(pl.cdiv(B, 2), 8))
    grid = (pl.cdiv(B, bm),)

    # VMEM budget from the actual footprint (constants single-buffered,
    # x/out tiles double-buffered, generous allowance for f32 intermediates).
    wbytes = jnp.dtype(weight_dtype).itemsize
    weight_vmem = D * 2 * HP * wbytes + (2 * HP + 3 * HP) * 4
    io_vmem = 2 * (bm * D * 4 + bm * OUT_LANES * 4)
    act_vmem = 8 * bm * HP * 4
    vmem_limit = int(min(64 << 20,
                         max(32 << 20, 2 * (weight_vmem + io_vmem + act_vmem))))

    # Grid-invariant operands: constant index maps keep them resident across
    # batch tiles; Buffered(1) avoids allocating a useless second buffer.
    const = dict(pipeline_mode=pl.Buffered(1))

    out = pl.pallas_call(
        _ptt_kernel,
        out_shape=jax.ShapeDtypeStruct((B, OUT_LANES), jnp.float32),
        grid=grid,
        in_specs=[
            pl.BlockSpec((bm, D), lambda i: (i, 0)),                  # x: batch-tiled
            pl.BlockSpec((D, 2 * HP), lambda i: (0, 0), **const),     # fused weight
            pl.BlockSpec((1, 2 * HP), lambda i: (0, 0), **const),     # fused bias
            pl.BlockSpec((1, HP), lambda i: (0, 0), **const),         # tw1p
            pl.BlockSpec((1, HP), lambda i: (0, 0), **const),         # w2 row
            pl.BlockSpec((1, HP), lambda i: (0, 0), **const),         # tw2 row
            pl.BlockSpec(memory_space=pltpu.MemorySpace.SMEM),        # scalar biases
        ],
        out_specs=pl.BlockSpec((bm, OUT_LANES), lambda i: (i, 0)),
        compiler_params=pltpu.CompilerParams(
            dimension_semantics=("parallel",),
            vmem_limit_bytes=vmem_limit),
    )(x, wbig, bbig, tw1p, w2row, tw2row, bias2)

    t = out[:B, 0:1]
    p_sig = out[:B, 1:2]
    return t, p_sig


def init_params(key, input_size):
    """Deterministic synthetic params. Shapes mirror the PyTorch module,
    with Linear weights transposed to [in, out]."""
    ks = jax.random.split(key, 8)

    def u(k, shape, fan_in):
        bound = 1.0 / jnp.sqrt(jnp.float32(fan_in))
        return jax.random.uniform(k, shape, jnp.float32, -bound, bound)

    D, H = input_size, HIDDEN
    return {
        # p_fc1: Linear(D, H)
        "w1": u(ks[0], (D, H), D),
        "b1": u(ks[1], (1, H), D),
        # p_bn: BatchNorm1d(H) (eval mode)
        "gamma": jnp.ones((1, H), jnp.float32),
        "beta": jnp.zeros((1, H), jnp.float32),
        "mean": jnp.zeros((1, H), jnp.float32),
        "var": jnp.ones((1, H), jnp.float32),
        # p_fc2: Linear(H, 1)
        "w2": u(ks[2], (H, 1), H),
        "b2": u(ks[3], (1, 1), H),
        # t_fc1: Linear(D + 1, H) split into x-part [D, H] and p-part [1, H]
        "tw1x": u(ks[4], (D, H), D + 1),
        "tw1p": u(ks[5], (1, H), D + 1),
        "tb1": u(ks[6], (1, H), D + 1),
        # t_fc2: Linear(H, 1)
        "tw2": u(ks[7], (H, 1), H),
        "tb2": jnp.zeros((1, 1), jnp.float32),
    }


def reference_forward(x, p):
    """Pure-JAX reference matching the PyTorch forward (eval mode), on the
    ORIGINAL (unfolded, unpadded, f32) parameters."""
    pre = x @ p["w1"] + p["b1"]
    pre = (pre - p["mean"]) / jnp.sqrt(p["var"] + BN_EPS) * p["gamma"] + p["beta"]
    pre = jnp.maximum(pre, 0.0)
    p_ns = pre @ p["w2"] + p["b2"]
    p_sig = jax.nn.sigmoid(p_ns)
    t = x @ p["tw1x"] + p_ns @ p["tw1p"] + p["tb1"]
    t = jnp.maximum(t, 0.0)
    t = jnp.maximum(t @ p["tw2"] + p["tb2"], 0.0)
    return t, p_sig


if __name__ == "__main__":
    key = jax.random.PRNGKey(0)
    k_x, k_p = jax.random.split(key)

    B, D = 8, 32
    x = jax.random.normal(k_x, (B, D), jnp.float32)
    params = init_params(k_p, D)

    t_out, psig_out = probability_to_time_forward(x, params)
    t_out, psig_out = jax.block_until_ready((t_out, psig_out))

    t_ref, psig_ref = reference_forward(x, params)
    assert t_out.shape == (B, 1) and psig_out.shape == (B, 1)
    # bf16 MXU weights (f32 accumulate): loosened tolerance vs the f32 reference.
    assert jnp.allclose(t_out, t_ref, atol=2e-2, rtol=2e-2)
    assert jnp.allclose(psig_out, psig_ref, atol=1e-2, rtol=1e-2)

    # Optional exact-parity path: f32 weights reproduce the reference to ~1e-5.
    t_f32, psig_f32 = probability_to_time_forward(
        x, params, weight_dtype=jnp.float32)
    t_f32, psig_f32 = jax.block_until_ready((t_f32, psig_f32))
    assert jnp.allclose(t_f32, t_ref, atol=1e-4, rtol=1e-4)
    assert jnp.allclose(psig_f32, psig_ref, atol=1e-5, rtol=1e-5)

    print("KERNEL_OK")
</pallas_src>

<mosaic_0001>
module attributes {stable_mosaic.version = 11 : i64} {
  func.func @_ptt_kernel(%arg0: i32, %arg1: memref<8x32xf32, #tpu.memory_space<vmem>>, %arg2: memref<32x2048xbf16, #tpu.memory_space<vmem>>, %arg3: memref<1x2048xf32, #tpu.memory_space<vmem>>, %arg4: memref<1x1024xf32, #tpu.memory_space<vmem>>, %arg5: memref<1x1024xf32, #tpu.memory_space<vmem>>, %arg6: memref<1x1024xf32, #tpu.memory_space<vmem>>, %arg7: memref<2xf32, #tpu.memory_space<smem>>, %arg8: memref<8x128xf32, #tpu.memory_space<vmem>>) attributes {dimension_semantics = [#tpu.dimension_semantics<parallel>], iteration_bounds = array<i64: 1>, scalar_prefetch = 0 : i64, scratch_operands = 0 : i64, tpu.core_type = #tpu.core_type<tc>, window_params = [{transform_indices = @transform_0, window_bounds = array<i64: 8, 32>}, {pipeline_mode = #tpu.pipeline_mode<synchronous>, transform_indices = @transform_1, window_bounds = array<i64: 32, 2048>}, {pipeline_mode = #tpu.pipeline_mode<synchronous>, transform_indices = @transform_2, window_bounds = array<i64: 1, 2048>}, {pipeline_mode = #tpu.pipeline_mode<synchronous>, transform_indices = @transform_3, window_bounds = array<i64: 1, 1024>}, {pipeline_mode = #tpu.pipeline_mode<synchronous>, transform_indices = @transform_4, window_bounds = array<i64: 1, 1024>}, {pipeline_mode = #tpu.pipeline_mode<synchronous>, transform_indices = @transform_5, window_bounds = array<i64: 1, 1024>}, {transform_indices = @transform_6, window_bounds = array<i64: 2>}, {transform_indices = @transform_7, window_bounds = array<i64: 8, 128>}]} {
    %c0 = arith.constant 0 : index
    %c0_0 = arith.constant 0 : index
    %0 = vector.load %arg1[%c0, %c0_0] : memref<8x32xf32, #tpu.memory_space<vmem>>, vector<8x32xf32>
    %1 = arith.truncf %0 : vector<8x32xf32> to vector<8x32xbf16>
    %c0_1 = arith.constant 0 : index
    %c0_2 = arith.constant 0 : index
    %2 = vector.load %arg2[%c0_1, %c0_2] : memref<32x2048xbf16, #tpu.memory_space<vmem>>, vector<32x2048xbf16>
    %cst = arith.constant dense<0.000000e+00> : vector<8x2048xf32>
    %3 = tpu.matmul %1, %2, %cst {dimension_numbers = #tpu.dot_dimension_numbers<[1], [0], [0], [1], [0, 0, 1, 1], [], []>} : vector<8x32xbf16>, vector<32x2048xbf16>, vector<8x2048xf32> -> vector<8x2048xf32>
    %c0_3 = arith.constant 0 : index
    %c0_4 = arith.constant 0 : index
    %4 = vector.load %arg3[%c0_3, %c0_4] : memref<1x2048xf32, #tpu.memory_space<vmem>>, vector<1x2048xf32>
    %5 = vector.broadcast %4 : vector<1x2048xf32> to vector<8x2048xf32>
    %6 = arith.addf %3, %5 : vector<8x2048xf32>
    %7 = vector.extract_strided_slice %6 {offsets = [0, 0], sizes = [8, 1024], strides = [1, 1]} : vector<8x2048xf32> to vector<8x1024xf32>
    %cst_5 = arith.constant 0.000000e+00 : f32
    %8 = vector.broadcast %cst_5 : f32 to vector<8x1024xf32>
    %9 = arith.maximumf %7, %8 : vector<8x1024xf32>
    %c0_6 = arith.constant 0 : index
    %c0_7 = arith.constant 0 : index
    %10 = vector.load %arg5[%c0_6, %c0_7] : memref<1x1024xf32, #tpu.memory_space<vmem>>, vector<1x1024xf32>
    %11 = vector.broadcast %10 : vector<1x1024xf32> to vector<8x1024xf32>
    %12 = arith.mulf %9, %11 : vector<8x1024xf32>
    %cst_8 = arith.constant dense<0.000000e+00> : vector<8xf32>
    %13 = vector.multi_reduction <add>, %12, %cst_8 [1] : vector<8x1024xf32> to vector<8xf32>
    %14 = vector.shape_cast %13 : vector<8xf32> to vector<8x1xf32>
    %c0_9 = arith.constant 0 : index
    %15 = memref.load %arg7[%c0_9] : memref<2xf32, #tpu.memory_space<smem>>
    %16 = vector.broadcast %15 : f32 to vector<8x1xf32>
    %17 = arith.addf %14, %16 : vector<8x1xf32>
    %18 = arith.negf %17 : vector<8x1xf32>
    %19 = math.exp %18 : vector<8x1xf32>
    %cst_10 = arith.constant 1.000000e+00 : f32
    %20 = vector.broadcast %cst_10 : f32 to vector<8x1xf32>
    %21 = arith.addf %20, %19 : vector<8x1xf32>
    %22 = arith.divf %20, %21 : vector<8x1xf32>
    %23 = vector.extract_strided_slice %6 {offsets = [0, 1024], sizes = [8, 1024], strides = [1, 1]} : vector<8x2048xf32> to vector<8x1024xf32>
    %c0_11 = arith.constant 0 : index
    %c0_12 = arith.constant 0 : index
    %24 = vector.load %arg4[%c0_11, %c0_12] : memref<1x1024xf32, #tpu.memory_space<vmem>>, vector<1x1024xf32>
    %25 = vector.broadcast %17 : vector<8x1xf32> to vector<8x1024xf32>
    %26 = vector.broadcast %24 : vector<1x1024xf32> to vector<8x1024xf32>
    %27 = arith.mulf %25, %26 : vector<8x1024xf32>
    %28 = arith.addf %23, %27 : vector<8x1024xf32>
    %cst_13 = arith.constant 0.000000e+00 : f32
    %29 = vector.broadcast %cst_13 : f32 to vector<8x1024xf32>
    %30 = arith.maximumf %28, %29 : vector<8x1024xf32>
    %c0_14 = arith.constant 0 : index
    %c0_15 = arith.constant 0 : index
    %31 = vector.load %arg6[%c0_14, %c0_15] : memref<1x1024xf32, #tpu.memory_space<vmem>>, vector<1x1024xf32>
    %32 = vector.broadcast %31 : vector<1x1024xf32> to vector<8x1024xf32>
    %33 = arith.mulf %30, %32 : vector<8x1024xf32>
    %cst_16 = arith.constant dense<0.000000e+00> : vector<8xf32>
    %34 = vector.multi_reduction <add>, %33, %cst_16 [1] : vector<8x1024xf32> to vector<8xf32>
    %35 = vector.shape_cast %34 : vector<8xf32> to vector<8x1xf32>
    %c1 = arith.constant 1 : index
    %36 = memref.load %arg7[%c1] : memref<2xf32, #tpu.memory_space<smem>>
    %37 = vector.broadcast %36 : f32 to vector<8x1xf32>
    %38 = arith.addf %35, %37 : vector<8x1xf32>
    %cst_17 = arith.constant 0.000000e+00 : f32
    %39 = vector.broadcast %cst_17 : f32 to vector<8x1xf32>
    %40 = arith.maximumf %38, %39 : vector<8x1xf32>
    %41 = tpu.iota {dimensions = array<i32: 1>} : vector<8x128xi32>
    %c0_i32 = arith.constant 0 : i32
    %42 = vector.broadcast %c0_i32 : i32 to vector<8x128xi32>
    %43 = arith.cmpi eq, %41, %42 : vector<8x128xi32>
    %c1_i32 = arith.constant 1 : i32
    %44 = vector.broadcast %c1_i32 : i32 to vector<8x128xi32>
    %45 = arith.cmpi eq, %41, %44 : vector<8x128xi32>
    %cst_18 = arith.constant 0.000000e+00 : f32
    %46 = vector.shape_cast %22 : vector<8x1xf32> to vector<8x1xf32>
    %47 = vector.broadcast %46 : vector<8x1xf32> to vector<8x128xf32>
    %48 = vector.broadcast %cst_18 : f32 to vector<8x128xf32>
    %49 = arith.select %45, %47, %48 : vector<8x128xi1>, vector<8x128xf32>
    %50 = vector.shape_cast %40 : vector<8x1xf32> to vector<8x1xf32>
    %51 = vector.broadcast %50 : vector<8x1xf32> to vector<8x128xf32>
    %52 = arith.select %43, %51, %49 : vector<8x128xi1>, vector<8x128xf32>
    %c0_19 = arith.constant 0 : index
    %c0_20 = arith.constant 0 : index
    %53 = vector.load %arg8[%c0_19, %c0_20] : memref<8x128xf32, #tpu.memory_space<vmem>>, vector<8x128xf32>
    tpu.vector_store %arg8[%c0_19, %c0_20], %52 {strides = array<i32>} : memref<8x128xf32, #tpu.memory_space<vmem>>, vector<8x128xf32>,
    return
  }
  func.func @transform_0(%arg0: i32) -> (i32, i32) {
    %c0_i32 = arith.constant 0 : i32
    %c0_i32_0 = arith.constant 0 : i32
    return %arg0, %c0_i32 : i32, i32
  }
  func.func @transform_1(%arg0: i32) -> (i32, i32) {
    %c0_i32 = arith.constant 0 : i32
    %c0_i32_0 = arith.constant 0 : i32
    %c0_i32_1 = arith.constant 0 : i32
    return %c0_i32, %c0_i32_0 : i32, i32
  }
  func.func @transform_2(%arg0: i32) -> (i32, i32) {
    %c0_i32 = arith.constant 0 : i32
    %c0_i32_0 = arith.constant 0 : i32
    %c0_i32_1 = arith.constant 0 : i32
    return %c0_i32, %c0_i32_0 : i32, i32
  }
  func.func @transform_3(%arg0: i32) -> (i32, i32) {
    %c0_i32 = arith.constant 0 : i32
    %c0_i32_0 = arith.constant 0 : i32
    %c0_i32_1 = arith.constant 0 : i32
    return %c0_i32, %c0_i32_0 : i32, i32
  }
  func.func @transform_4(%arg0: i32) -> (i32, i32) {
    %c0_i32 = arith.constant 0 : i32
    %c0_i32_0 = arith.constant 0 : i32
    %c0_i32_1 = arith.constant 0 : i32
    return %c0_i32, %c0_i32_0 : i32, i32
  }
  func.func @transform_5(%arg0: i32) -> (i32, i32) {
    %c0_i32 = arith.constant 0 : i32
    %c0_i32_0 = arith.constant 0 : i32
    %c0_i32_1 = arith.constant 0 : i32
    return %c0_i32, %c0_i32_0 : i32, i32
  }
  func.func @transform_6(%arg0: i32) -> i32 {
    %c0_i32 = arith.constant 0 : i32
    %c0_i32_0 = arith.constant 0 : i32
    return %c0_i32 : i32
  }
  func.func @transform_7(%arg0: i32) -> (i32, i32) {
    %c0_i32 = arith.constant 0 : i32
    %c0_i32_0 = arith.constant 0 : i32
    return %arg0, %c0_i32 : i32, i32
  }
}

</mosaic_0001>

<bundles_post_ra>
// kernel: probability_to_time_forward.1
= control target key start
LH: loop header
LB: loop body
LE: loop exit
PB: predicated region body
PF: predicated region fallthrough
CT: control target
= control target key end

     0   :  { %12 = vsyncpa [#allocation3], 0  ;;  %s1185_s0 = inlined_call_operand.vmem [shape: f32[8,32], index: 0, kind: input, shape index: {}]   ;;  %s1186_s1 = inlined_call_operand.vmem [shape: bf16[32,2048], index: 1, kind: input, shape index: {}]   ;;  %s1187_s2 = inlined_call_operand.vmem [shape: f32[1,2048], index: 2, kind: input, shape index: {}]   ;;  %s1188_s3 = inlined_call_operand.vmem [shape: f32[1,1024], index: 3, kind: input, shape index: {}]   ;;  %s1189_s4 = inlined_call_operand.vmem [shape: f32[1,1024], index: 4, kind: input, shape index: {}]   ;;  %s1190_s5 = inlined_call_operand.vmem [shape: f32[1,1024], index: 5, kind: input, shape index: {}]   ;;  %s1191_s6 = inlined_call_operand.vmem [shape: f32[2], index: 6, kind: input, shape index: {}]   ;;  %s1192_s7 = inlined_call_operand.vmem [shape: f32[8,128], index: 7, kind: output, shape index: {}]  }
   0x1   :  { %s31_s26 = sshll.u32 %s1191_s6, 4  ;;  %s32_s26 = int_to_ptr.vmem [resolvable:$true] %s31_s26 }
   0x2   :  { %s915_s27 = scalar_lea.vmem %s32_s26, 16  ;;  %p920_p1 = scmp.lt.s32.totalorder %s32_s26, %s32_s26 }
   0x3   :  { %p916_p0 = scmp.ne.s32.totalorder %s32_s26, %s915_s27  ;;  %p921_p2 = scmp.lt.s32.totalorder %s915_s27, %s915_s27 }
   0x5   :  { %p922_p3 = por %p921_p2, %p920_p1 }
   0x7   :  { %p923_p4 = pnand %p922_p3, %p916_p0 }
   0x9   :  { %926 = shalt.err (!%p923_p4)
}
   0xa   :  { %s929_s28 = smov [#allocation2]  }
   0xb   :  { %34 = dma.vmem_to_smem %s32_s26, 16, %s929_s28, [#allocation3]  }
   0xc   :  { %927 = dma.done.wait [#allocation3], 16  }
   0xd   :  { %928 = vsyncadd [#allocation3], 4294967280 }
   0xe   :  { %38 = sfence }
   0xf   :  { %v42_v0 = vld [vmem:[%s1186_s1] sm:$0xff]  ;;  %v43_v2 = vld [vmem:[%s1186_s1 + $0x8] sm:$0xff]  ;;  %v930_v8 = vmov 0   ;;  %v44_v15 = vld [vmem:[%s1186_s1 + $0x10] sm:$0xff]  ;;  %vm318_vm0 = vcmask 261120  }
  0x10   :  { %v50_v1 = vld [vmem:[%s1186_s1 + $0x40] sm:$0xff]  ;;  %v51_v5 = vld [vmem:[%s1186_s1 + $0x48] sm:$0xff]  ;;  %354 = vmatprep.mubr.bf16.mxu0 %v930_v8  ;;  %395 = vmatprep.mubr.bf16.mxu1 %v930_v8  ;;  %v52_v16 = vld [vmem:[%s1186_s1 + $0x50] sm:$0xff] }
  0x11   :  { %v868_v3 = vcombine.high %v42_v0, %v50_v1  ;;  %v867_v4 = vcombine.low %v42_v0, %v50_v1  ;;  %v58_v6 = vld [vmem:[%s1186_s1 + $0x80] sm:$0xff]  ;;  %v870_v9 = vcombine.high %v43_v2, %v51_v5  ;;  %v869_v10 = vcombine.low %v43_v2, %v51_v5  ;;  %v59_v12 = vld [vmem:[%s1186_s1 + $0x88] sm:$0xff]  ;;  %v45_v17 = vld [vmem:[%s1186_s1 + $0x18] sm:$0xff] }
  0x12   :  { %v66_v7 = vld [vmem:[%s1186_s1 + $0xc0] sm:$0xff]  ;;  %v67_v13 = vld [vmem:[%s1186_s1 + $0xc8] sm:$0xff]  ;;  %v53_v20 = vld [vmem:[%s1186_s1 + $0x58] sm:$0xff]  ;;  %v872_v22 = vcombine.high %v44_v15, %v52_v16  ;;  %v871_v29 = vcombine.low %v44_v15, %v52_v16 }
  0x13   :  { %v884_v11 = vcombine.high %v58_v6, %v66_v7  ;;  %322 = vmatprep.subr.bf16.mxu0 %v868_v3  ;;  %v886_v14 = vcombine.high %v59_v12, %v67_v13  ;;  %363 = vmatprep.subr.bf16.mxu1 %v870_v9  ;;  %v883_v18 = vcombine.low %v58_v6, %v66_v7  ;;  %v40_v19 = vld [vmem:[%s1185_s0] sm:$0xff]  ;;  %v60_v24 = vld [vmem:[%s1186_s1 + $0x90] sm:$0xff]  ;;  %v61_v27 = vld [vmem:[%s1186_s1 + $0x98] sm:$0xff]  ;;  %v78_v3 = vlaneseq }
  0x14   :  { %323 = vmatpush1.bf16.msra.mxu0 %v867_v4  ;;  %364 = vmatpush1.bf16.msra.mxu1 %v869_v10  ;;  %v885_v21 = vcombine.low %v59_v12, %v67_v13  ;;  %v874_v23 = vcombine.high %v45_v17, %v53_v20  ;;  %v68_v25 = vld [vmem:[%s1186_s1 + $0xd0] sm:$0xff]  ;;  %v1021_v26 = vpack.c.bf16 %v40_v19, %v40_v19  ;;  %v69_v28 = vld [vmem:[%s1186_s1 + $0xd8] sm:$0xff]  ;;  %v46_v33 = vld [vmem:[%s1186_s1 + $0x20] sm:$0xff] }
  0x15   :  { %324 = vmatprep.subr.bf16.mxu0 %v884_v11  ;;  %365 = vmatprep.subr.bf16.mxu1 %v886_v14  ;;  %v873_v30 = vcombine.low %v45_v17, %v53_v20  ;;  %v888_v31 = vcombine.high %v60_v24, %v68_v25  ;;  %v890_v32 = vcombine.high %v61_v27, %v69_v28  ;;  %v54_v34 = vld [vmem:[%s1186_s1 + $0x60] sm:$0xff]  ;;  %v47_v35 = vld [vmem:[%s1186_s1 + $0x28] sm:$0xff]  ;;  %v48_v49 = vld [vmem:[%s1186_s1 + $0x30] sm:$0xff]  ;;  %v79_v4 = vshrl.u32 %v78_v3, 7 }
  0x16   :  { %v55_v36 = vld [vmem:[%s1186_s1 + $0x68] sm:$0xff]  ;;  %v887_v37 = vcombine.low %v60_v24, %v68_v25  ;;  %v889_v38 = vcombine.low %v61_v27, %v69_v28  ;;  %v876_v39 = vcombine.high %v46_v33, %v54_v34  ;;  %v62_v41 = vld [vmem:[%s1186_s1 + $0xa0] sm:$0xff]  ;;  %v875_v45 = vcombine.low %v46_v33, %v54_v34  ;;  %v56_v50 = vld [vmem:[%s1186_s1 + $0x70] sm:$0xff] }
  0x17   :  { %v878_v40 = vcombine.high %v47_v35, %v55_v36  ;;  %v70_v42 = vld [vmem:[%s1186_s1 + $0xe0] sm:$0xff]  ;;  %v63_v43 = vld [vmem:[%s1186_s1 + $0xa8] sm:$0xff]  ;;  %v877_v46 = vcombine.low %v47_v35, %v55_v36  ;;  %v49_v51 = vld [vmem:[%s1186_s1 + $0x38] sm:$0xff]  ;;  %v880_v55 = vcombine.high %v48_v49, %v56_v50  ;;  %v879_v61 = vcombine.low %v48_v49, %v56_v50 }
  0x18   :  { %325 = vmatpush1.bf16.msra.mxu0 %v883_v18  ;;  %366 = vmatpush1.bf16.msra.mxu1 %v885_v21  ;;  %v71_v44 = vld [vmem:[%s1186_s1 + $0xe8] sm:$0xff]  ;;  %v892_v47 = vcombine.high %v62_v41, %v70_v42  ;;  %v57_v52 = vld [vmem:[%s1186_s1 + $0x78] sm:$0xff]  ;;  %v891_v53 = vcombine.low %v62_v41, %v70_v42  ;;  %v64_v57 = vld [vmem:[%s1186_s1 + $0xb0] sm:$0xff]  ;;  %v1100_v5 = vsub.s32 0, %v79_v4  ;;  %v1105_v7 = vsub.s32 1, %v79_v4 }
  0x19   :  { %404 = vmatprep.subr.bf16.mxu0 %v872_v22  ;;  %445 = vmatprep.subr.bf16.mxu1 %v874_v23  ;;  %v894_v48 = vcombine.high %v63_v43, %v71_v44  ;;  %v893_v54 = vcombine.low %v63_v43, %v71_v44  ;;  %v882_v56 = vcombine.high %v49_v51, %v57_v52  ;;  %v72_v58 = vld [vmem:[%s1186_s1 + $0xf0] sm:$0xff]  ;;  %v65_v59 = vld [vmem:[%s1186_s1 + $0xb8] sm:$0xff]  ;;  %v74_v6 = vld [vmem:[%s1187_s2] sm:$0xff]  ;;  %v1109_v9 = vsub.s32 3, %v79_v4 }
  0x1a   :  { %v73_v60 = vld [vmem:[%s1186_s1 + $0xf8] sm:$0xff]  ;;  %v881_v62 = vcombine.low %v49_v51, %v57_v52  ;;  %v896_v63 = vcombine.high %v64_v57, %v72_v58  ;;  %v895_v1 = vcombine.low %v64_v57, %v72_v58  ;;  %v81_v10 = vrot.slane %v74_v6, %v1100_v5  ;;  %v1115_v11 = vld [vmem:[%s1189_s4] sm:$0xff]  ;;  %s717_s4 = sld [smem:[#allocation2]] }
  0x1b   :  { %899 = vmatmul.mubr.msk.bf16.vlgmr.msra.gmra.mrb[0].mxu0 %vm318_vm0, %v1021_v26  ;;  %900 = vmatmul.mubr.msk.bf16.vlgmr.msra.gmra.mrb[0].mxu1 %vm318_vm0, %v1021_v26  ;;  %v898_v0 = vcombine.high %v65_v59, %v73_v60  ;;  %v897_v2 = vcombine.low %v65_v59, %v73_v60  ;;  %v85_v12 = vrot.slane %v74_v6, %v1105_v7  ;;  %v1126_v22 = vsub.s32 4, %v79_v4 }
  0x1c   :  { %405 = vmatpush1.bf16.msra.mxu0 %v871_v29  ;;  %446 = vmatpush1.bf16.msra.mxu1 %v873_v30  ;;  %v93_v14 = vrot.slane %v74_v6, %v1109_v9  ;;  %v663_v16 = vrot.slane %v1115_v11, %v1100_v5  ;;  %v667_v19 = vrot.slane %v1115_v11, %v1105_v7  ;;  %v1128_v27 = vsub.s32 5, %v79_v4 }
  0x1d   :  { %406 = vmatprep.subr.bf16.mxu0 %v888_v31  ;;  %447 = vmatprep.subr.bf16.mxu1 %v890_v32  ;;  %v1130_v28 = vsub.s32 6, %v79_v4  ;;  %v1132_v33 = vsub.s32 7, %v79_v4  ;;  %v675_v36 = vrot.slane %v1115_v11, %v1109_v9  ;;  %v679_v50 = vrot.slane %v1115_v11, %v1126_v22 }
  0x1e   :  { %436 = vmatprep.mubr.bf16.mxu0 %v930_v8  ;;  %477 = vmatprep.mubr.bf16.mxu1 %v930_v8  ;;  %v101_v43 = vrot.slane %v74_v6, %v1128_v27 }
  0x1f   :  { %v105_v44 = vrot.slane %v74_v6, %v1130_v28  ;;  %v687_v60 = vrot.slane %v1115_v11, %v1130_v28 }
  0x20   :  { %407 = vmatpush1.bf16.msra.mxu0 %v887_v37  ;;  %448 = vmatpush1.bf16.msra.mxu1 %v889_v38 }
  0x21   :  { %486 = vmatprep.subr.bf16.mxu0 %v876_v39  ;;  %527 = vmatprep.subr.bf16.mxu1 %v878_v40  ;;  %v97_v40 = vrot.slane %v74_v6, %v1126_v22 }
  0x23   :  { %901 = vmatmul.mubr.msk.bf16.vlgmr.msra.gmra.mrb[4].mxu0 %vm318_vm0, %v1021_v26  ;;  %902 = vmatmul.mubr.msk.bf16.vlgmr.msra.gmra.mrb[4].mxu1 %vm318_vm0, %v1021_v26 }
  0x24   :  { %487 = vmatpush1.bf16.msra.mxu0 %v875_v45  ;;  %528 = vmatpush1.bf16.msra.mxu1 %v877_v46  ;;  %v109_v45 = vrot.slane %v74_v6, %v1132_v33 }
  0x25   :  { %488 = vmatprep.subr.bf16.mxu0 %v892_v47  ;;  %529 = vmatprep.subr.bf16.mxu1 %v894_v48 }
  0x26   :  { %518 = vmatprep.mubr.bf16.mxu0 %v930_v8  ;;  %559 = vmatprep.mubr.bf16.mxu1 %v930_v8 }
  0x28   :  { %489 = vmatpush1.bf16.msra.mxu0 %v891_v53  ;;  %530 = vmatpush1.bf16.msra.mxu1 %v893_v54 }
  0x29   :  { %568 = vmatprep.subr.bf16.mxu0 %v880_v55  ;;  %609 = vmatprep.subr.bf16.mxu1 %v882_v56  ;;  %v683_v55 = vrot.slane %v1115_v11, %v1128_v27 }
  0x2b   :  { %903 = vmatmul.mubr.msk.bf16.vlgmr.msra.gmra.mrb[8].mxu0 %vm318_vm0, %v1021_v26  ;;  %904 = vmatmul.mubr.msk.bf16.vlgmr.msra.gmra.mrb[8].mxu1 %vm318_vm0, %v1021_v26 }
  0x2c   :  { %569 = vmatpush1.bf16.msra.mxu0 %v879_v61  ;;  %610 = vmatpush1.bf16.msra.mxu1 %v881_v62 }
  0x2d   :  { %570 = vmatprep.subr.bf16.mxu0 %v896_v63  ;;  %611 = vmatprep.subr.bf16.mxu1 %v898_v0 }
  0x2e   :  { %600 = vmatprep.mubr.bf16.mxu0 %v930_v8  ;;  %641 = vmatprep.mubr.bf16.mxu1 %v930_v8  ;;  %v1107_v8 = vsub.s32 2, %v79_v4 }
  0x30   :  { %571 = vmatpush1.bf16.msra.mxu0 %v895_v1  ;;  %612 = vmatpush1.bf16.msra.mxu1 %v897_v2  ;;  %v89_v13 = vrot.slane %v74_v6, %v1107_v8  ;;  %v671_v21 = vrot.slane %v1115_v11, %v1107_v8 }
  0x33   :  { %905 = vmatmul.mubr.msk.bf16.vlgmr.msra.gmra.mrb[12].mxu0 %vm318_vm0, %v1021_v26  ;;  %906 = vmatmul.mubr.msk.bf16.vlgmr.msra.gmra.mrb[12].mxu1 %vm318_vm0, %v1021_v26 }
  0xee   :  { %v356_v15 = vpop.f32.mrb[0].mxu0  ;;  %v397_v20 = vpop.f32.mrb[0].mxu1 }
  0xef   :  { %v357_v17 = vadd.f32 %v356_v15, %v81_v10  ;;  %v358_v18 = vpop.f32.mrb[1].mxu0  ;;  %v398_v25 = vadd.f32 %v397_v20, %v89_v13  ;;  %v399_v26 = vpop.f32.mrb[1].mxu1  ;;  %v691_v15 = vrot.slane %v1115_v11, %v1132_v33 }
  0xf0   :  { %v359_v23 = vadd.f32 %v358_v18, %v85_v12  ;;  %v360_v24 = vpop.f32.mrb[2].mxu0  ;;  %v400_v31 = vadd.f32 %v399_v26, %v93_v14  ;;  %v401_v32 = vpop.f32.mrb[2].mxu1 }
  0xf1   :  { %v650_v29 = vmax.f32 %v357_v17, 0.0  ;;  %v361_v30 = vpop.f32.mrb[3].mxu0  ;;  %v652_v35 = vmax.f32 %v398_v25, 0.0  ;;  %v402_v37 = vpop.f32.mrb[3].mxu1 }
  0xf2   :  { %v651_v34 = vmax.f32 %v359_v23, 0.0  ;;  %v653_v39 = vmax.f32 %v400_v31, 0.0 }
  0xf3   :  { %v700_v38 = vmul.f32 %v663_v16, %v650_v29  ;;  %v702_v42 = vmul.f32 %v671_v21, %v652_v35 }
  0xf4   :  { %v701_v41 = vmul.f32 %v667_v19, %v651_v34  ;;  %v703_v47 = vmul.f32 %v675_v36, %v653_v39  ;;  %v75_v39 = vld [vmem:[%s1187_s2 + $0x8] sm:$0xff] }
  0xf6   :  { %v708_v46 = vadd.f32 %v701_v41, %v700_v38  ;;  %v438_v48 = vpop.f32.mrb[4].mxu0  ;;  %v479_v52 = vpop.f32.mrb[4].mxu1  ;;  %v121_v41 = vrot.slane %v75_v39, %v1107_v8 }
  0xf7   :  { %v439_v49 = vadd.f32 %v438_v48, %v97_v40  ;;  %v440_v51 = vpop.f32.mrb[5].mxu0  ;;  %v480_v57 = vadd.f32 %v479_v52, %v105_v44  ;;  %v481_v58 = vpop.f32.mrb[5].mxu1  ;;  %v113_v40 = vrot.slane %v75_v39, %v1100_v5  ;;  %v125_v44 = vrot.slane %v75_v39, %v1109_v9 }
  0xf8   :  { %v709_v53 = vadd.f32 %v708_v46, %v702_v42  ;;  %v441_v54 = vadd.f32 %v440_v51, %v101_v43  ;;  %v442_v56 = vpop.f32.mrb[6].mxu0  ;;  %v482_v62 = vadd.f32 %v481_v58, %v109_v45  ;;  %v483_v63 = vpop.f32.mrb[6].mxu1  ;;  %v117_v42 = vrot.slane %v75_v39, %v1105_v7  ;;  %v726_v43 = vld [vmem:[%s1188_s3] sm:$0xff] }
  0xf9   :  { %v654_v59 = vmax.f32 %v439_v49, 0.0  ;;  %v443_v61 = vpop.f32.mrb[7].mxu0  ;;  %v656_v2 = vmax.f32 %v480_v57, 0.0  ;;  %v484_v4 = vpop.f32.mrb[7].mxu1  ;;  %v718_v46 = vstv %s717_s4  ;;  %v133_v48 = vrot.slane %v75_v39, %v1128_v27 }
  0xfa   :  { %v710_v0 = vadd.f32 %v709_v53, %v703_v47  ;;  %v655_v1 = vmax.f32 %v441_v54, 0.0  ;;  %v657_v14 = vmax.f32 %v482_v62, 0.0  ;;  %v129_v47 = vrot.slane %v75_v39, %v1126_v22 }
  0xfb   :  { %v704_v6 = vmul.f32 %v679_v50, %v654_v59  ;;  %v706_v13 = vmul.f32 %v687_v60, %v656_v2  ;;  %v731_v49 = vrot.slane %v726_v43, %v1100_v5  ;;  %v735_v50 = vrot.slane %v726_v43, %v1105_v7  ;;  %v792_v60 = vld [vmem:[%s1190_s5] sm:$0xff]  ;;  %s908_s5 = sld [smem:[#allocation2 + $0x1]] }
  0xfc   :  { %v705_v10 = vmul.f32 %v683_v55, %v655_v1  ;;  %v707_v23 = vmul.f32 %v691_v15, %v657_v14  ;;  %v739_v51 = vrot.slane %v726_v43, %v1107_v8  ;;  %v743_v52 = vrot.slane %v726_v43, %v1109_v9 }
  0xfd   :  { %v711_v12 = vadd.f32 %v710_v0, %v704_v6  ;;  %v747_v56 = vrot.slane %v726_v43, %v1126_v22  ;;  %v751_v57 = vrot.slane %v726_v43, %v1128_v27  ;;  %v137_v61 = vrot.slane %v75_v39, %v1130_v28 }
  0xfe   :  { %v520_v16 = vpop.f32.mrb[8].mxu0  ;;  %v561_v18 = vpop.f32.mrb[8].mxu1  ;;  %v755_v62 = vrot.slane %v726_v43, %v1130_v28  ;;  %v141_v1 = vrot.slane %v75_v39, %v1132_v33  ;;  %v759_v2 = vrot.slane %v726_v43, %v1132_v33  ;;  %v797_v14 = vrot.slane %v792_v60, %v1100_v5 }
  0xff   :  { %v712_v17 = vadd.f32 %v711_v12, %v705_v10  ;;  %v522_v19 = vpop.f32.mrb[9].mxu0  ;;  %v563_v20 = vpop.f32.mrb[9].mxu1  ;;  %v521_v45 = vadd.f32 %v520_v16, %v113_v40  ;;  %v562_v53 = vadd.f32 %v561_v18, %v121_v41  ;;  %v801_v15 = vrot.slane %v792_v60, %v1105_v7 }
 0x100   :  { %v524_v21 = vpop.f32.mrb[10].mxu0  ;;  %v565_v25 = vpop.f32.mrb[10].mxu1  ;;  %v523_v54 = vadd.f32 %v522_v19, %v117_v42  ;;  %v564_v58 = vadd.f32 %v563_v20, %v125_v44 }
 0x101   :  { %v713_v24 = vadd.f32 %v712_v17, %v706_v13  ;;  %v525_v26 = vpop.f32.mrb[11].mxu0  ;;  %v566_v29 = vpop.f32.mrb[11].mxu1  ;;  %v805_v21 = vrot.slane %v792_v60, %v1107_v8 }
 0x103   :  { %v714_v30 = vadd.f32 %v713_v24, %v707_v23 }
 0x105   :  { %715 = vadd.xlane.f32.xlu0 %v714_v30 }
 0x106   :  { %v602_v31 = vpop.f32.mrb[12].mxu0  ;;  %v643_v32 = vpop.f32.mrb[12].mxu1 }
 0x107   :  { %v604_v34 = vpop.f32.mrb[13].mxu0  ;;  %v645_v35 = vpop.f32.mrb[13].mxu1  ;;  %v603_v63 = vadd.f32 %v602_v31, %v129_v47  ;;  %v644_v23 = vadd.f32 %v643_v32, %v137_v61  ;;  %v809_v31 = vrot.slane %v792_v60, %v1109_v9  ;;  %v817_v32 = vrot.slane %v792_v60, %v1128_v27 }
 0x108   :  { %v606_v36 = vpop.f32.mrb[14].mxu0  ;;  %v647_v37 = vpop.f32.mrb[14].mxu1  ;;  %v605_v0 = vadd.f32 %v604_v34, %v133_v48  ;;  %v646_v34 = vadd.f32 %v645_v35, %v141_v1  ;;  %v821_v47 = vrot.slane %v792_v60, %v1130_v28  ;;  %v852_v28 = vstv %s908_s5 }
 0x109   :  { %v607_v11 = vpop.f32.mrb[15].mxu0  ;;  %v648_v38 = vpop.f32.mrb[15].mxu1 }
 0x10a   :  { %v813_v38 = vrot.slane %v792_v60, %v1126_v22  ;;  %v825_v22 = vrot.slane %v792_v60, %v1132_v33 }
 0x192   :  { %v716_v55 = vpop.xlane.xlu0 %715 }
 0x193   :  { %v719_v59 = vadd.f32 %v718_v46, %v716_v55 }
 0x195   :  { %v768_v4 = vmul.f32 %v731_v49, %v719_v59  ;;  %v769_v6 = vmul.f32 %v735_v50, %v719_v59  ;;  %v770_v10 = vmul.f32 %v739_v51, %v719_v59  ;;  %v771_v12 = vmul.f32 %v743_v52, %v719_v59 }
 0x196   :  { %v772_v13 = vmul.f32 %v747_v56, %v719_v59  ;;  %v773_v16 = vmul.f32 %v751_v57, %v719_v59  ;;  %v774_v24 = vmul.f32 %v755_v62, %v719_v59  ;;  %v775_v36 = vmul.f32 %v759_v2, %v719_v59 }
 0x197   :  { %v776_v17 = vadd.f32 %v768_v4, %v521_v45  ;;  %v777_v18 = vadd.f32 %v769_v6, %v523_v54  ;;  %v778_v19 = vadd.f32 %v770_v10, %v562_v53  ;;  %v779_v20 = vadd.f32 %v771_v12, %v564_v58 }
 0x198   :  { %v780_v25 = vadd.f32 %v772_v13, %v603_v63  ;;  %v781_v11 = vadd.f32 %v773_v16, %v605_v0  ;;  %v782_v8 = vadd.f32 %v774_v24, %v644_v23  ;;  %v783_v45 = vadd.f32 %v775_v36, %v646_v34 }
 0x199   :  { %v784_v26 = vmax.f32 %v776_v17, 0.0  ;;  %v785_v29 = vmax.f32 %v777_v18, 0.0  ;;  %v786_v30 = vmax.f32 %v778_v19, 0.0  ;;  %v787_v5 = vmax.f32 %v779_v20, 0.0 }
 0x19a   :  { %v788_v39 = vmax.f32 %v780_v25, 0.0  ;;  %v789_v44 = vmax.f32 %v781_v11, 0.0  ;;  %v790_v35 = vmax.f32 %v782_v8, 0.0  ;;  %v791_v50 = vmax.f32 %v783_v45, 0.0 }
 0x19b   :  { %v834_v37 = vmul.f32 %v797_v14, %v784_v26  ;;  %v835_v7 = vmul.f32 %v801_v15, %v785_v29  ;;  %v836_v40 = vmul.f32 %v805_v21, %v786_v30  ;;  %v837_v42 = vmul.f32 %v809_v31, %v787_v5 }
 0x19c   :  { %v838_v46 = vmul.f32 %v813_v38, %v788_v39  ;;  %v839_v49 = vmul.f32 %v817_v32, %v789_v44  ;;  %v840_v51 = vmul.f32 %v821_v47, %v790_v35  ;;  %v841_v53 = vmul.f32 %v825_v22, %v791_v50 }
 0x19d   :  { %v842_v41 = vadd.f32 %v835_v7, %v834_v37  ;;  %v907_v27 = vmul.f32 -1.442695, %v719_v59  ;;  %v856_v58 = vand.u32 127, %v78_v3 }
 0x19f   :  { %v843_v43 = vadd.f32 %v842_v41, %v836_v40  ;;  %911 = vpow2.f32 %v907_v27  ;;  %vm858_vm1 = vcmp.eq.s32.totalorder %v856_v58, 1  ;;  %vm857_vm2 = vcmp.eq.s32.totalorder %v856_v58, 0 }
 0x1a1   :  { %v844_v9 = vadd.f32 %v843_v43, %v837_v42 }
 0x1a3   :  { %v845_v48 = vadd.f32 %v844_v9, %v838_v46 }
 0x1a5   :  { %v846_v52 = vadd.f32 %v845_v48, %v839_v49 }
 0x1a7   :  { %v847_v54 = vadd.f32 %v846_v52, %v840_v51 }
 0x1a9   :  { %v848_v55 = vadd.f32 %v847_v54, %v841_v53  ;;  %v912_v56 = vpop.eup %911 }
 0x1aa   :  { %v723_v57 = vadd.f32 1.0, %v912_v56 }
 0x1ab   :  { %849 = vadd.xlane.f32.xlu0 %v848_v55 }
 0x1ac   :  { %913 = vrcp.f32 %v723_v57 }
 0x1b6   :  { %v914_v62 = vpop.eup %913 }
 0x1b7   :  { %v859_v60 = vsel %vm858_vm1, %v914_v62, 0.0 }
 0x238   :  { %v850_v61 = vpop.xlane.xlu0 %849 }
 0x239   :  { %v853_v63 = vadd.f32 %v852_v28, %v850_v61 }
 0x23b   :  { %v854_v33 = vmax.f32 %v853_v63, 0.0 }
 0x23d   :  { %v860_v0 = vsel %vm857_vm2, %v854_v33, %v859_v60 }
 0x23e   :  { %861 = vst [vmem:[%s1192_s7] sm:$0xff] %v860_v0 }
 0x23f   :  { %866 = vsyncpa [#allocation3], 1 }

</bundles_post_ra>
